<compile_context>
chip_gen: v7x
topology: tpu7x:2x2x1
jax: 0.10.0
libtpu: 0.0.40
codegen_flags: <defaults>
</compile_context>

<pallas_src>
import functools
import math

import jax
import jax.numpy as jnp
from jax.experimental import pallas as pl
from jax.experimental.pallas import tpu as pltpu


def _layernorm_kernel(x_ref, w_ref, b_ref, o_ref, *, eps):
    x = x_ref[...].astype(jnp.float32)                   # (tm, H)
    u = jnp.mean(x, axis=-1, keepdims=True)              # (tm, 1)
    xc = x - u
    s = jnp.mean(xc * xc, axis=-1, keepdims=True)        # (tm, 1) two-pass (stable)
    inv = jax.lax.rsqrt(s + eps)                         # EUP slot
    y = xc * inv
    w = w_ref[...].astype(jnp.float32)                   # (1, H), resident
    b = b_ref[...].astype(jnp.float32)                   # (1, H), resident
    o_ref[...] = (w * y + b).astype(o_ref.dtype)


def _sublane_multiple(dtype):
    # f32 -> 8, bf16/f16 -> 16, int8/fp8 -> 32 (sub-32-bit packs along sublanes)
    itemsize = jnp.dtype(dtype).itemsize
    return max(8, 32 // max(itemsize, 1))


def _vmem_capacity_bytes():
    try:
        return int(pltpu.get_tpu_info().vmem_capacity_bytes)
    except Exception:
        # Conservative fallback: v7x per-TensorCore VMEM.
        return 64 * 1024 * 1024


def _num_tensorcores():
    """Best-effort TensorCore count per device (2 on v7x / v5p / v4, else 1)."""
    try:
        dev = jax.devices()[0]
        kind = str(getattr(dev, "device_kind", "")).lower()
        for tag in ("v7", "v5p", "v4"):
            if tag in kind:
                return 2
        nc = getattr(dev, "num_cores", None)
        if isinstance(nc, int) and nc > 0:
            return nc
    except Exception:
        pass
    return 1


def _bytes_per_row(hidden, in_dtype, out_dtype):
    in_b = jnp.dtype(in_dtype).itemsize
    out_b = jnp.dtype(out_dtype).itemsize
    # Double-buffered input + output pipeline blocks, plus the in-kernel f32
    # working copies (x upcast to f32 and the centered copy): ~2*H*4 B/row.
    return 2 * hidden * (in_b + out_b) + 2 * hidden * 4


def _vmem_budget_bytes():
    # ~50% of physical VMEM for pipeline blocks + f32 temps; the rest is
    # headroom for weight/bias and compiler scratch.
    return int(_vmem_capacity_bytes() * 0.5)


def _select_block_rows(rows, hidden, in_dtype, out_dtype, num_cores):
    """Pick a row tile sized by block bytes against this chip's VMEM budget."""
    sub = max(_sublane_multiple(in_dtype), _sublane_multiple(out_dtype))
    budget = _vmem_budget_bytes()
    tm = budget // _bytes_per_row(hidden, in_dtype, out_dtype)
    tm = max(sub, (tm // sub) * sub)

    # Only on multi-TensorCore chips (v7x): keep enough grid steps so the
    # "parallel" row axis can shard work across both cores.
    if num_cores > 1:
        min_steps = 2 * num_cores
        per_step = max(sub, pl.cdiv(pl.cdiv(rows, min_steps), sub) * sub)
        if rows > per_step:
            tm = min(tm, per_step)

    # A tile never needs to exceed the row count (full-dim block is allowed).
    if tm >= rows:
        tm = rows
    return tm, sub


def bert_layer_norm(x, weight, bias, eps=1e-12, block_rows=None):
    """x: [..., hidden]; weight/bias: [hidden]. Matches BertLayerNorm.forward."""
    orig_shape = x.shape
    hidden = orig_shape[-1]
    rows = int(math.prod(orig_shape[:-1])) if len(orig_shape) > 1 else 1
    out_dtype = x.dtype

    x2 = x.reshape(rows, hidden)
    w2 = weight.reshape(1, hidden)
    b2 = bias.reshape(1, hidden)

    num_cores = _num_tensorcores()
    tm_auto, sub = _select_block_rows(rows, hidden, x.dtype, out_dtype, num_cores)
    if block_rows is None:
        tm = tm_auto
    else:
        tm = max(sub, (int(block_rows) // sub) * sub)
        # Validate user choice against the VMEM budget and the row count.
        budget_tm = max(
            sub,
            (_vmem_budget_bytes() // _bytes_per_row(hidden, x.dtype, out_dtype) // sub) * sub,
        )
        tm = min(tm, budget_tm)
        if tm >= rows:
            tm = rows

    # No padding: rows are independent; Pallas clips reads/writes of the
    # ragged boundary block, so garbage rows there never reach HBM.
    grid = (pl.cdiv(rows, tm),)

    # Scoped VMEM limit: double-buffered in/out pipeline blocks + in-kernel
    # f32 temporaries + resident weight/bias + headroom, clamped to capacity.
    in_b = jnp.dtype(x.dtype).itemsize
    out_b = jnp.dtype(out_dtype).itemsize
    block_vmem = 2 * tm * hidden * (in_b + out_b)          # 2x-buffered in + out
    temps_vmem = 2 * tm * hidden * 4                       # f32 x + centered copy
    wb_vmem = 2 * 2 * hidden * max(jnp.dtype(weight.dtype).itemsize, 4)
    vmem_limit = int(
        min(
            _vmem_capacity_bytes(),
            max(block_vmem + temps_vmem + wb_vmem + (4 << 20), 32 << 20),
        )
    )

    kernel = functools.partial(_layernorm_kernel, eps=float(eps))

    out = pl.pallas_call(
        kernel,
        out_shape=jax.ShapeDtypeStruct((rows, hidden), out_dtype),
        grid_spec=pltpu.PrefetchScalarGridSpec(
            num_scalar_prefetch=0,
            grid=grid,
            in_specs=[
                pl.BlockSpec((tm, hidden), lambda i: (i, 0)),
                pl.BlockSpec((1, hidden), lambda i: (0, 0)),   # weight: resident
                pl.BlockSpec((1, hidden), lambda i: (0, 0)),   # bias: resident
            ],
            out_specs=pl.BlockSpec((tm, hidden), lambda i: (i, 0)),
        ),
        compiler_params=pltpu.CompilerParams(
            dimension_semantics=("parallel",),
            vmem_limit_bytes=vmem_limit,
        ),
    )(x2, w2, b2)

    return out.reshape(orig_shape)


def _reference(x, weight, bias, eps):
    u = jnp.mean(x, axis=-1, keepdims=True)
    s = jnp.mean((x - u) ** 2, axis=-1, keepdims=True)
    return weight * ((x - u) / jnp.sqrt(s + eps)) + bias


if __name__ == "__main__":
    key = jax.random.PRNGKey(0)
    batch, seq, hidden = 2, 8, 32
    kx, kw, kb = jax.random.split(key, 3)
    x = jax.random.normal(kx, (batch, seq, hidden), dtype=jnp.float32)

    # Parameter init matching nn.Parameter(torch.ones/zeros(hidden))
    weight = jnp.ones((hidden,), dtype=jnp.float32)
    bias = jnp.zeros((hidden,), dtype=jnp.float32)

    out = bert_layer_norm(x, weight, bias, eps=1e-12)
    jax.block_until_ready(out)
    ref = _reference(x, weight, bias, 1e-12)
    assert jnp.allclose(out, ref, atol=1e-5, rtol=1e-5), "mismatch vs reference"

    # Non-trivial affine params + odd row count with a forced small tile
    # (13 rows, tm=8) to exercise the ragged boundary block (no padding path).
    w2 = jax.random.normal(kw, (hidden,), dtype=jnp.float32)
    b2 = jax.random.normal(kb, (hidden,), dtype=jnp.float32)
    x_odd = x.reshape(batch * seq, hidden)[:13]
    out2 = bert_layer_norm(x_odd, w2, b2, eps=1e-12, block_rows=8)
    jax.block_until_ready(out2)
    ref2 = _reference(x_odd, w2, b2, 1e-12)
    assert jnp.allclose(out2, ref2, atol=1e-5, rtol=1e-5), "mismatch (affine/ragged rows)"

    # Auto tile selection on the odd row count (tile clamps to full row dim).
    out3 = bert_layer_norm(x_odd, w2, b2, eps=1e-12)
    jax.block_until_ready(out3)
    assert jnp.allclose(out3, ref2, atol=1e-5, rtol=1e-5), "mismatch (auto tile)"

    print("KERNEL_OK")
</pallas_src>

<mosaic_0001>
module attributes {stable_mosaic.version = 11 : i64} {
  func.func @_layernorm_kernel(%arg0: i32, %arg1: memref<16x32xf32, #tpu.memory_space<vmem>>, %arg2: memref<1x32xf32, #tpu.memory_space<vmem>>, %arg3: memref<1x32xf32, #tpu.memory_space<vmem>>, %arg4: memref<16x32xf32, #tpu.memory_space<vmem>>) attributes {dimension_semantics = [#tpu.dimension_semantics<parallel>], iteration_bounds = array<i64: 1>, scalar_prefetch = 0 : i64, scratch_operands = 0 : i64, tpu.core_type = #tpu.core_type<tc>, window_params = [{transform_indices = @transform_0, window_bounds = array<i64: 16, 32>}, {pipeline_mode = #tpu.pipeline_mode<synchronous>, transform_indices = @transform_1, window_bounds = array<i64: 1, 32>}, {pipeline_mode = #tpu.pipeline_mode<synchronous>, transform_indices = @transform_2, window_bounds = array<i64: 1, 32>}, {transform_indices = @transform_3, window_bounds = array<i64: 16, 32>}]} {
    %c0 = arith.constant 0 : index
    %c0_0 = arith.constant 0 : index
    %0 = vector.load %arg1[%c0, %c0_0] : memref<16x32xf32, #tpu.memory_space<vmem>>, vector<16x32xf32>
    %cst = arith.constant dense<0.000000e+00> : vector<16xf32>
    %1 = vector.multi_reduction <add>, %0, %cst [1] : vector<16x32xf32> to vector<16xf32>
    %2 = vector.shape_cast %1 : vector<16xf32> to vector<16x1xf32>
    %cst_1 = arith.constant 3.200000e+01 : f32
    %3 = vector.broadcast %cst_1 : f32 to vector<16x1xf32>
    %4 = arith.divf %2, %3 : vector<16x1xf32>
    %5 = vector.broadcast %4 : vector<16x1xf32> to vector<16x32xf32>
    %6 = arith.subf %0, %5 : vector<16x32xf32>
    %7 = arith.mulf %6, %6 : vector<16x32xf32>
    %cst_2 = arith.constant dense<0.000000e+00> : vector<16xf32>
    %8 = vector.multi_reduction <add>, %7, %cst_2 [1] : vector<16x32xf32> to vector<16xf32>
    %9 = vector.shape_cast %8 : vector<16xf32> to vector<16x1xf32>
    %cst_3 = arith.constant 3.200000e+01 : f32
    %10 = vector.broadcast %cst_3 : f32 to vector<16x1xf32>
    %11 = arith.divf %9, %10 : vector<16x1xf32>
    %cst_4 = arith.constant 9.99999996E-13 : f32
    %12 = vector.broadcast %cst_4 : f32 to vector<16x1xf32>
    %13 = arith.addf %11, %12 : vector<16x1xf32>
    %14 = math.rsqrt %13 : vector<16x1xf32>
    %15 = vector.broadcast %14 : vector<16x1xf32> to vector<16x32xf32>
    %16 = arith.mulf %6, %15 : vector<16x32xf32>
    %c0_5 = arith.constant 0 : index
    %c0_6 = arith.constant 0 : index
    %17 = vector.load %arg2[%c0_5, %c0_6] : memref<1x32xf32, #tpu.memory_space<vmem>>, vector<1x32xf32>
    %c0_7 = arith.constant 0 : index
    %c0_8 = arith.constant 0 : index
    %18 = vector.load %arg3[%c0_7, %c0_8] : memref<1x32xf32, #tpu.memory_space<vmem>>, vector<1x32xf32>
    %19 = vector.broadcast %17 : vector<1x32xf32> to vector<16x32xf32>
    %20 = arith.mulf %19, %16 : vector<16x32xf32>
    %21 = vector.broadcast %18 : vector<1x32xf32> to vector<16x32xf32>
    %22 = arith.addf %20, %21 : vector<16x32xf32>
    %c0_9 = arith.constant 0 : index
    %c0_10 = arith.constant 0 : index
    %23 = vector.load %arg4[%c0_9, %c0_10] : memref<16x32xf32, #tpu.memory_space<vmem>>, vector<16x32xf32>
    tpu.vector_store %arg4[%c0_9, %c0_10], %22 {strides = array<i32>} : memref<16x32xf32, #tpu.memory_space<vmem>>, vector<16x32xf32>,
    return
  }
  func.func @transform_0(%arg0: i32) -> (i32, i32) {
    %c0_i32 = arith.constant 0 : i32
    %c0_i32_0 = arith.constant 0 : i32
    return %arg0, %c0_i32 : i32, i32
  }
  func.func @transform_1(%arg0: i32) -> (i32, i32) {
    %c0_i32 = arith.constant 0 : i32
    %c0_i32_0 = arith.constant 0 : i32
    %c0_i32_1 = arith.constant 0 : i32
    return %c0_i32, %c0_i32_0 : i32, i32
  }
  func.func @transform_2(%arg0: i32) -> (i32, i32) {
    %c0_i32 = arith.constant 0 : i32
    %c0_i32_0 = arith.constant 0 : i32
    %c0_i32_1 = arith.constant 0 : i32
    return %c0_i32, %c0_i32_0 : i32, i32
  }
  func.func @transform_3(%arg0: i32) -> (i32, i32) {
    %c0_i32 = arith.constant 0 : i32
    %c0_i32_0 = arith.constant 0 : i32
    return %arg0, %c0_i32 : i32, i32
  }
}

</mosaic_0001>

<bundles_post_ra>
// kernel: tpu_custom_call.1
= control target key start
LH: loop header
LB: loop body
LE: loop exit
PB: predicated region body
PF: predicated region fallthrough
CT: control target
= control target key end

     0   :  { %8 = vsyncpa [#allocation3], 0  ;;  %s220_s0 = inlined_call_operand.hbm [shape: f32[16,32], index: 0, kind: input, shape index: {}]   ;;  %s221_s1 = inlined_call_operand.vmem [shape: f32[1,32], index: 1, kind: input, shape index: {}]   ;;  %s222_s2 = inlined_call_operand.vmem [shape: f32[1,32], index: 2, kind: input, shape index: {}]   ;;  %s223_s3 = inlined_call_operand.hbm [shape: f32[16,32], index: 3, kind: output, shape index: {}]  }
   0x1   :  { %9 = vsyncpa [#allocation4], 0  ;;  %s154_s12 = smov [#allocation2]   ;;  %s106_s16 = scalar_lea.hbm %s220_s0, 256 }
   0x2   :  { %s15_s13 = sshll.u32 %s154_s12, 4  ;;  %p107_p0 = scmp.ne.s32.totalorder %s220_s0, %s106_s16  ;;  %s16_s13 = int_to_ptr.vmem [resolvable:$true] %s15_s13 }
   0x3   :  { %p110_p1 = scmp.lt.u32.totalorder %s106_s16, %s220_s0 }
   0x5   :  { %p112_p2 = pnand %p110_p1, %p107_p0 }
   0x7   :  { %115 = shalt.err (!%p112_p2)
}
   0x8   :  { %s116_s21 = scalar_lea.vmem %s16_s13, 256  ;;  %p121_p4 = scmp.lt.s32.totalorder %s16_s13, %s16_s13 }
   0x9   :  { %p117_p3 = scmp.ne.s32.totalorder %s16_s13, %s116_s21  ;;  %p122_p5 = scmp.lt.s32.totalorder %s116_s21, %s116_s21 }
   0xb   :  { %p123_p6 = por %p122_p5, %p121_p4 }
   0xd   :  { %p124_p7 = pnand %p123_p6, %p117_p3 }
   0xf   :  { %127 = shalt.err (!%p124_p7)
}
  0x10   :  { %s155_s22 = smov 128   ;;  %s156_s23 = smov 8  }
  0x11   :  { %21 = dma.hbm_to_vmem [thread:$0]  %s220_s0, 256, %s16_s13, [#allocation3], %s155_s22, %s155_s22, %s156_s23  }
  0x12   :  { %150 = dma.done.wait [#allocation3], 256  }
  0x13   :  { %151 = vsyncadd [#allocation3], 4294967040  ;;  %vm31_vm0 = vcmask 261120   ;;  %v29_v0 = vld [vmem:[#allocation2] sm:$0xff]  ;;  %v30_v1 = vld [vmem:[#allocation2 + $0x8] sm:$0xff]  ;;  %s157_s29 = smov [#allocation5]  }
  0x14   :  { %v32_v2 = vsel %vm31_vm0, %v29_v0, 0.0  ;;  %v35_v3 = vsel %vm31_vm0, %v30_v1, 0.0  ;;  %v96_v21 = vld [vmem:[%s221_s1] ss:$0 sm:$0xff]  ;;  %s84_s30 = sshll.u32 %s157_s29, 4  ;;  %s85_s30 = int_to_ptr.vmem [resolvable:$true] %s84_s30 }
  0x15   :  { %33 = vadd.xlane.f32.xlu0 %v32_v2  ;;  %v97_v23 = vld [vmem:[%s222_s2] ss:$0 sm:$0xff]  ;;  %s128_s4 = scalar_lea.vmem %s85_s30, 256  ;;  %p133_p9 = scmp.lt.s32.totalorder %s85_s30, %s85_s30 }
  0x16   :  { %p129_p8 = scmp.ne.s32.totalorder %s85_s30, %s128_s4  ;;  %p134_p10 = scmp.lt.s32.totalorder %s128_s4, %s128_s4 }
  0x18   :  { %p135_p11 = por %p134_p10, %p133_p9 }
  0x19   :  { %36 = vadd.xlane.f32.xlu0 %v35_v3 }
  0x1a   :  { %p136_p12 = pnand %p135_p11, %p129_p8 }
  0xa2   :  { %v34_v4 = vpop.xlane.xlu0 %33 }
  0xa3   :  { %v39_v5 = vmul.f32 0.03125, %v34_v4 }
  0xa5   :  { %v41_v6 = vsub.f32 %v29_v0, %v39_v5 }
  0xa6   :  { %v37_v7 = vpop.xlane.xlu0 %36 }
  0xa7   :  { %v40_v8 = vmul.f32 0.03125, %v37_v7  ;;  %v43_v9 = vmul.f32 %v41_v6, %v41_v6 }
  0xa9   :  { %v42_v10 = vsub.f32 %v30_v1, %v40_v8  ;;  %v45_v11 = vsel %vm31_vm0, %v43_v9, 0.0 }
  0xaa   :  { %46 = vadd.xlane.f32.xlu1 %v45_v11 }
  0xab   :  { %v44_v12 = vmul.f32 %v42_v10, %v42_v10 }
  0xad   :  { %v48_v13 = vsel %vm31_vm0, %v44_v12, 0.0 }
  0xae   :  { %49 = vadd.xlane.f32.xlu1 %v48_v13 }
 0x137   :  { %v47_v14 = vpop.xlane.xlu1 %46 }
 0x138   :  { %v51_v15 = vmul.f32 0.03125, %v47_v14 }
 0x13a   :  { %v53_v16 = vadd.f32 1e-12, %v51_v15 }
 0x13b   :  { %v50_v17 = vpop.xlane.xlu1 %49 }
 0x13c   :  { %102 = vrsqrt.f32 %v53_v16  ;;  %v52_v18 = vmul.f32 0.03125, %v50_v17 }
 0x13e   :  { %v54_v19 = vadd.f32 1e-12, %v52_v18 }
 0x140   :  { %104 = vrsqrt.f32 %v54_v19 }
 0x146   :  { %v103_v20 = vpop.eup %102 }
 0x147   :  { %v57_v22 = vmul.f32 %v103_v20, %v41_v6 }
 0x149   :  { %v67_v24 = vmul.f32 %v96_v21, %v57_v22 }
 0x14a   :  { %v105_v25 = vpop.eup %104 }
 0x14b   :  { %v58_v26 = vmul.f32 %v105_v25, %v42_v10  ;;  %v75_v27 = vadd.f32 %v97_v23, %v67_v24 }
 0x14d   :  { %v68_v28 = vmul.f32 %v96_v21, %v58_v26  ;;  %77 = vst.msk [vmem:[#allocation5] sm:$0xff] %vm31_vm0, %v75_v27 }
 0x14f   :  { %v76_v29 = vadd.f32 %v97_v23, %v68_v28 }
 0x151   :  { %78 = vst.msk [vmem:[#allocation5 + $0x8] sm:$0xff] %vm31_vm0, %v76_v29 }
 0x152   :  { %139 = shalt.err (!%p136_p12)
}
 0x153   :  { %s140_s5 = scalar_lea.hbm %s223_s3, 256 }
 0x154   :  { %p141_p13 = scmp.ne.s32.totalorder %s223_s3, %s140_s5  ;;  %p144_p0 = scmp.lt.u32.totalorder %s140_s5, %s223_s3 }
 0x156   :  { %p146_p1 = pnand %p144_p0, %p141_p13 }
 0x158   :  { %149 = shalt.err (!%p146_p1)
}
 0x159   :  { %90 = dma.vmem_to_hbm [thread:$0]  %s85_s30, 256, %s223_s3, [#allocation4], %s155_s22, %s155_s22, %s156_s23  }
 0x15a   :  { %152 = dma.done.wait [#allocation4], 256  }
 0x15b   :  { %153 = vsyncadd [#allocation4], 4294967040 }
 0x15c   :  { %94 = vsyncpa [#allocation3], 1 }
 0x15d   :  { %95 = vsyncpa [#allocation4], 1 }

</bundles_post_ra>
